<compile_context>
chip_gen: v5e
topology: v5e:2x2
jax: 0.10.0
libtpu: 0.0.40
codegen_flags: <defaults>
</compile_context>

<pallas_src>
import functools

import jax
import jax.numpy as jnp
from jax.experimental import pallas as pl
from jax.experimental.pallas import tpu as pltpu


def _round_up(x, m):
    return ((x + m - 1) // m) * m


def _ffn_layernorm_kernel(x_ref, w1_ref, b1_ref, w2_ref, b2_ref,
                          gamma_ref, beta_ref, o_ref, *, d_valid):
    """Fused FFN (linear1 -> gelu -> linear2) + residual + LayerNorm for one token tile.

    x_ref:     (TILE_N, Dp)  token tile (native dtype, fed to MXU as-is)
    w1_ref:    (Dp, Fp)      linear1 weight, transposed+padded
    b1_ref:    (1, Fp)       f32
    w2_ref:    (Fp, Dp)      linear2 weight, transposed+padded
    b2_ref:    (1, Dp)       f32
    gamma_ref: (1, Dp)       f32 (zero in padded columns)
    beta_ref:  (1, Dp)       f32 (zero in padded columns)
    o_ref:     (TILE_N, Dp)
    """
    x = x_ref[...]                       # keep MXU operands in native dtype

    # linear1 (f32 accumulation on the MXU)
    h = jnp.dot(x, w1_ref[...], preferred_element_type=jnp.float32) + b1_ref[...]

    # exact (erf-based) GELU, matching torch.nn.functional.gelu default
    inv_sqrt2 = jnp.float32(0.7071067811865476)
    h = 0.5 * h * (1.0 + jax.lax.erf(h * inv_sqrt2))

    # linear2 (cast hidden back to the weight dtype so bf16 weights hit the
    # bf16 MXU path; no-op for f32)
    y = jnp.dot(h.astype(w2_ref.dtype), w2_ref[...],
                preferred_element_type=jnp.float32) + b2_ref[...]

    # residual add (dropout p=0.0 -> identity); epilogue in f32
    z = x.astype(jnp.float32) + y

    # one-pass LayerNorm stats over the *valid* feature count (padded cols are 0)
    inv_d = jnp.float32(1.0 / d_valid)
    s1 = jnp.sum(z, axis=-1, keepdims=True)
    s2 = jnp.sum(z * z, axis=-1, keepdims=True)
    mean = s1 * inv_d
    var = s2 * inv_d - mean * mean
    zn = (z - mean) * jax.lax.rsqrt(var + jnp.float32(1e-5))

    out = zn * gamma_ref[...] + beta_ref[...]   # padded cols -> 0
    o_ref[...] = out.astype(o_ref.dtype)


def prepare_params(params, compute_dtype=jnp.float32):
    """One-time preprocessing: transpose PyTorch-layout weights and pad the
    feature dims to lane-dense multiples of 128. Call once, reuse per forward."""
    w1, b1, w2, b2, gamma, beta = params
    f_dim, d_model = w1.shape                      # linear1.weight is (F, D)
    dp = _round_up(d_model, 128)
    fp = _round_up(f_dim, 128)

    w1_t = jnp.zeros((dp, fp), compute_dtype).at[:d_model, :f_dim].set(
        jnp.asarray(w1, compute_dtype).T)
    w2_t = jnp.zeros((fp, dp), compute_dtype).at[:f_dim, :d_model].set(
        jnp.asarray(w2, compute_dtype).T)
    b1_p = jnp.zeros((1, fp), jnp.float32).at[0, :f_dim].set(
        jnp.asarray(b1, jnp.float32))
    b2_p = jnp.zeros((1, dp), jnp.float32).at[0, :d_model].set(
        jnp.asarray(b2, jnp.float32))
    g_p = jnp.zeros((1, dp), jnp.float32).at[0, :d_model].set(
        jnp.asarray(gamma, jnp.float32))
    be_p = jnp.zeros((1, dp), jnp.float32).at[0, :d_model].set(
        jnp.asarray(beta, jnp.float32))

    return {
        "w1_t": w1_t, "b1": b1_p, "w2_t": w2_t, "b2": b2_p,
        "gamma": g_p, "beta": be_p,
        "d_model": d_model, "dim_feedforward": f_dim,
    }


def ffn_layer_forward(tgt, prepared, tile_n=256):
    """FFNLayer.forward_post on tgt of shape (S, B, D)."""
    S, B, D = tgt.shape
    assert D == prepared["d_model"]
    N = S * B

    w1_t = prepared["w1_t"]
    w2_t = prepared["w2_t"]
    dp, fp = w1_t.shape

    x2d = tgt.reshape(N, D)
    if dp != D:
        x2d = jnp.pad(x2d, ((0, 0), (0, dp - D)))

    # token-tile sizing: multiple of 8, no larger than the (rounded) token count
    tile_n = max(8, min(_round_up(tile_n, 8), _round_up(N, 8)))
    n_pad = _round_up(N, tile_n)
    if n_pad != N:
        x2d = jnp.pad(x2d, ((0, n_pad - N), (0, 0)))

    grid = (n_pad // tile_n,)

    # VMEM budget: resident weights + double-buffered x/out tiles + f32
    # intermediates, with headroom; clamped to stay safe on v7x (64 MiB).
    w_item = jnp.dtype(w1_t.dtype).itemsize
    x_item = jnp.dtype(x2d.dtype).itemsize
    resident = 2 * dp * fp * w_item + (fp + 3 * dp) * 4
    tiles = 2 * 2 * tile_n * dp * x_item
    interm = 2 * tile_n * fp * 4 + 4 * tile_n * dp * 4
    vmem_limit = int(1.5 * (resident + tiles + interm)) + (4 << 20)
    vmem_limit = min(max(vmem_limit, 32 << 20), 64 << 20)

    kernel = functools.partial(_ffn_layernorm_kernel, d_valid=D)

    out = pl.pallas_call(
        kernel,
        out_shape=jax.ShapeDtypeStruct((n_pad, dp), tgt.dtype),
        grid=grid,
        in_specs=[
            pl.BlockSpec((tile_n, dp), lambda i: (i, 0)),   # x tile (pipelined)
            pl.BlockSpec((dp, fp), lambda i: (0, 0)),       # w1^T (resident)
            pl.BlockSpec((1, fp), lambda i: (0, 0)),        # b1
            pl.BlockSpec((fp, dp), lambda i: (0, 0)),       # w2^T (resident)
            pl.BlockSpec((1, dp), lambda i: (0, 0)),        # b2
            pl.BlockSpec((1, dp), lambda i: (0, 0)),        # gamma
            pl.BlockSpec((1, dp), lambda i: (0, 0)),        # beta
        ],
        out_specs=pl.BlockSpec((tile_n, dp), lambda i: (i, 0)),
        compiler_params=pltpu.CompilerParams(
            dimension_semantics=("parallel",),
            vmem_limit_bytes=vmem_limit,
        ),
    )(x2d, w1_t, prepared["b1"], w2_t, prepared["b2"],
      prepared["gamma"], prepared["beta"])

    return out[:N, :D].reshape(S, B, D)


def init_params(key, d_model, dim_feedforward):
    """Deterministic init mirroring FFNLayer.__init__ + _reset_parameters.

    Weights (dim > 1): xavier_uniform_.  Biases: nn.Linear default
    uniform(-1/sqrt(fan_in), 1/sqrt(fan_in)).  LayerNorm: ones / zeros.
    """
    k1, k2, k3, k4 = jax.random.split(key, 4)

    def xavier(k, out_f, in_f):
        a = jnp.sqrt(6.0 / (in_f + out_f))
        return jax.random.uniform(k, (out_f, in_f), jnp.float32, -a, a)

    w1 = xavier(k1, dim_feedforward, d_model)          # linear1.weight (F, D)
    b1 = jax.random.uniform(k2, (dim_feedforward,), jnp.float32,
                            -1.0 / jnp.sqrt(d_model), 1.0 / jnp.sqrt(d_model))
    w2 = xavier(k3, d_model, dim_feedforward)          # linear2.weight (D, F)
    b2 = jax.random.uniform(k4, (d_model,), jnp.float32,
                            -1.0 / jnp.sqrt(dim_feedforward),
                            1.0 / jnp.sqrt(dim_feedforward))
    gamma = jnp.ones((d_model,), jnp.float32)
    beta = jnp.zeros((d_model,), jnp.float32)
    return (w1, b1, w2, b2, gamma, beta)


def ffn_layer_reference(tgt, params):
    """Pure-JAX reference of FFNLayer.forward_post (PyTorch layout params)."""
    w1, b1, w2, b2, gamma, beta = params
    h = jnp.einsum('sbd,fd->sbf', tgt, w1) + b1
    h = jax.nn.gelu(h, approximate=False)
    y = jnp.einsum('sbf,df->sbd', h, w2) + b2
    z = tgt + y
    mean = jnp.mean(z, axis=-1, keepdims=True)
    var = jnp.mean((z - mean) ** 2, axis=-1, keepdims=True)
    zn = (z - mean) / jnp.sqrt(var + 1e-5)
    return zn * gamma + beta


if __name__ == "__main__":
    key = jax.random.PRNGKey(0)
    k_in, k_params = jax.random.split(key)

    # Small shapes consistent with the module: seq=8, batch=2, d_model=32, ff=64.
    S, B, D, F_DIM = 8, 2, 32, 64
    tgt = jax.random.normal(k_in, (S, B, D), jnp.float32)
    params = init_params(k_params, D, F_DIM)

    prepared = prepare_params(params)                  # one-time transpose+pad
    out = jax.block_until_ready(ffn_layer_forward(tgt, prepared))
    ref = jax.block_until_ready(ffn_layer_reference(tgt, params))

    assert out.shape == (S, B, D)
    assert jnp.allclose(out, ref, atol=1e-4, rtol=1e-4), \
        f"max abs err {jnp.max(jnp.abs(out - ref))}"
    print("KERNEL_OK")
</pallas_src>

<mosaic_0001>
module attributes {stable_mosaic.version = 11 : i64} {
  func.func @_ffn_layernorm_kernel(%arg0: i32, %arg1: memref<16x128xf32, #tpu.memory_space<vmem>>, %arg2: memref<128x128xf32, #tpu.memory_space<vmem>>, %arg3: memref<1x128xf32, #tpu.memory_space<vmem>>, %arg4: memref<128x128xf32, #tpu.memory_space<vmem>>, %arg5: memref<1x128xf32, #tpu.memory_space<vmem>>, %arg6: memref<1x128xf32, #tpu.memory_space<vmem>>, %arg7: memref<1x128xf32, #tpu.memory_space<vmem>>, %arg8: memref<16x128xf32, #tpu.memory_space<vmem>>) attributes {dimension_semantics = [#tpu.dimension_semantics<parallel>], iteration_bounds = array<i64: 1>, scalar_prefetch = 0 : i64, scratch_operands = 0 : i64, tpu.core_type = #tpu.core_type<tc>, window_params = [{transform_indices = @transform_0, window_bounds = array<i64: 16, 128>}, {pipeline_mode = #tpu.pipeline_mode<synchronous>, transform_indices = @transform_1, window_bounds = array<i64: 128, 128>}, {pipeline_mode = #tpu.pipeline_mode<synchronous>, transform_indices = @transform_2, window_bounds = array<i64: 1, 128>}, {pipeline_mode = #tpu.pipeline_mode<synchronous>, transform_indices = @transform_3, window_bounds = array<i64: 128, 128>}, {pipeline_mode = #tpu.pipeline_mode<synchronous>, transform_indices = @transform_4, window_bounds = array<i64: 1, 128>}, {pipeline_mode = #tpu.pipeline_mode<synchronous>, transform_indices = @transform_5, window_bounds = array<i64: 1, 128>}, {pipeline_mode = #tpu.pipeline_mode<synchronous>, transform_indices = @transform_6, window_bounds = array<i64: 1, 128>}, {transform_indices = @transform_7, window_bounds = array<i64: 16, 128>}]} {
    %c0 = arith.constant 0 : index
    %c0_0 = arith.constant 0 : index
    %0 = vector.load %arg1[%c0, %c0_0] : memref<16x128xf32, #tpu.memory_space<vmem>>, vector<16x128xf32>
    %c0_1 = arith.constant 0 : index
    %c0_2 = arith.constant 0 : index
    %1 = vector.load %arg2[%c0_1, %c0_2] : memref<128x128xf32, #tpu.memory_space<vmem>>, vector<128x128xf32>
    %cst = arith.constant dense<0.000000e+00> : vector<16x128xf32>
    %2 = tpu.matmul %0, %1, %cst {dimension_numbers = #tpu.dot_dimension_numbers<[1], [0], [0], [1], [0, 0, 1, 1], [], []>} : vector<16x128xf32>, vector<128x128xf32>, vector<16x128xf32> -> vector<16x128xf32>
    %c0_3 = arith.constant 0 : index
    %c0_4 = arith.constant 0 : index
    %3 = vector.load %arg3[%c0_3, %c0_4] : memref<1x128xf32, #tpu.memory_space<vmem>>, vector<1x128xf32>
    %4 = vector.broadcast %3 : vector<1x128xf32> to vector<16x128xf32>
    %5 = arith.addf %2, %4 : vector<16x128xf32>
    %cst_5 = arith.constant 5.000000e-01 : f32
    %6 = vector.broadcast %cst_5 : f32 to vector<16x128xf32>
    %7 = arith.mulf %6, %5 : vector<16x128xf32>
    %cst_6 = arith.constant 0.707106769 : f32
    %8 = vector.broadcast %cst_6 : f32 to vector<16x128xf32>
    %9 = arith.mulf %5, %8 : vector<16x128xf32>
    %10 = math.erf %9 : vector<16x128xf32>
    %cst_7 = arith.constant 1.000000e+00 : f32
    %11 = vector.broadcast %cst_7 : f32 to vector<16x128xf32>
    %12 = arith.addf %11, %10 : vector<16x128xf32>
    %13 = arith.mulf %7, %12 : vector<16x128xf32>
    %c0_8 = arith.constant 0 : index
    %c0_9 = arith.constant 0 : index
    %14 = vector.load %arg4[%c0_8, %c0_9] : memref<128x128xf32, #tpu.memory_space<vmem>>, vector<128x128xf32>
    %cst_10 = arith.constant dense<0.000000e+00> : vector<16x128xf32>
    %15 = tpu.matmul %13, %14, %cst_10 {dimension_numbers = #tpu.dot_dimension_numbers<[1], [0], [0], [1], [0, 0, 1, 1], [], []>} : vector<16x128xf32>, vector<128x128xf32>, vector<16x128xf32> -> vector<16x128xf32>
    %c0_11 = arith.constant 0 : index
    %c0_12 = arith.constant 0 : index
    %16 = vector.load %arg5[%c0_11, %c0_12] : memref<1x128xf32, #tpu.memory_space<vmem>>, vector<1x128xf32>
    %17 = vector.broadcast %16 : vector<1x128xf32> to vector<16x128xf32>
    %18 = arith.addf %15, %17 : vector<16x128xf32>
    %19 = arith.addf %0, %18 : vector<16x128xf32>
    %cst_13 = arith.constant dense<0.000000e+00> : vector<16xf32>
    %20 = vector.multi_reduction <add>, %19, %cst_13 [1] : vector<16x128xf32> to vector<16xf32>
    %21 = vector.shape_cast %20 : vector<16xf32> to vector<16x1xf32>
    %22 = arith.mulf %19, %19 : vector<16x128xf32>
    %cst_14 = arith.constant dense<0.000000e+00> : vector<16xf32>
    %23 = vector.multi_reduction <add>, %22, %cst_14 [1] : vector<16x128xf32> to vector<16xf32>
    %24 = vector.shape_cast %23 : vector<16xf32> to vector<16x1xf32>
    %cst_15 = arith.constant 3.125000e-02 : f32
    %25 = vector.broadcast %cst_15 : f32 to vector<16x1xf32>
    %26 = arith.mulf %21, %25 : vector<16x1xf32>
    %cst_16 = arith.constant 3.125000e-02 : f32
    %27 = vector.broadcast %cst_16 : f32 to vector<16x1xf32>
    %28 = arith.mulf %24, %27 : vector<16x1xf32>
    %29 = arith.mulf %26, %26 : vector<16x1xf32>
    %30 = arith.subf %28, %29 : vector<16x1xf32>
    %31 = vector.broadcast %26 : vector<16x1xf32> to vector<16x128xf32>
    %32 = arith.subf %19, %31 : vector<16x128xf32>
    %cst_17 = arith.constant 9.99999974E-6 : f32
    %33 = vector.broadcast %cst_17 : f32 to vector<16x1xf32>
    %34 = arith.addf %30, %33 : vector<16x1xf32>
    %35 = math.rsqrt %34 : vector<16x1xf32>
    %36 = vector.broadcast %35 : vector<16x1xf32> to vector<16x128xf32>
    %37 = arith.mulf %32, %36 : vector<16x128xf32>
    %c0_18 = arith.constant 0 : index
    %c0_19 = arith.constant 0 : index
    %38 = vector.load %arg6[%c0_18, %c0_19] : memref<1x128xf32, #tpu.memory_space<vmem>>, vector<1x128xf32>
    %39 = vector.broadcast %38 : vector<1x128xf32> to vector<16x128xf32>
    %40 = arith.mulf %37, %39 : vector<16x128xf32>
    %c0_20 = arith.constant 0 : index
    %c0_21 = arith.constant 0 : index
    %41 = vector.load %arg7[%c0_20, %c0_21] : memref<1x128xf32, #tpu.memory_space<vmem>>, vector<1x128xf32>
    %42 = vector.broadcast %41 : vector<1x128xf32> to vector<16x128xf32>
    %43 = arith.addf %40, %42 : vector<16x128xf32>
    %c0_22 = arith.constant 0 : index
    %c0_23 = arith.constant 0 : index
    %44 = vector.load %arg8[%c0_22, %c0_23] : memref<16x128xf32, #tpu.memory_space<vmem>>, vector<16x128xf32>
    tpu.vector_store %arg8[%c0_22, %c0_23], %43 {strides = array<i32>} : memref<16x128xf32, #tpu.memory_space<vmem>>, vector<16x128xf32>,
    return
  }
  func.func @transform_0(%arg0: i32) -> (i32, i32) {
    %c0_i32 = arith.constant 0 : i32
    %c0_i32_0 = arith.constant 0 : i32
    return %arg0, %c0_i32 : i32, i32
  }
  func.func @transform_1(%arg0: i32) -> (i32, i32) {
    %c0_i32 = arith.constant 0 : i32
    %c0_i32_0 = arith.constant 0 : i32
    %c0_i32_1 = arith.constant 0 : i32
    return %c0_i32, %c0_i32_0 : i32, i32
  }
  func.func @transform_2(%arg0: i32) -> (i32, i32) {
    %c0_i32 = arith.constant 0 : i32
    %c0_i32_0 = arith.constant 0 : i32
    %c0_i32_1 = arith.constant 0 : i32
    return %c0_i32, %c0_i32_0 : i32, i32
  }
  func.func @transform_3(%arg0: i32) -> (i32, i32) {
    %c0_i32 = arith.constant 0 : i32
    %c0_i32_0 = arith.constant 0 : i32
    %c0_i32_1 = arith.constant 0 : i32
    return %c0_i32, %c0_i32_0 : i32, i32
  }
  func.func @transform_4(%arg0: i32) -> (i32, i32) {
    %c0_i32 = arith.constant 0 : i32
    %c0_i32_0 = arith.constant 0 : i32
    %c0_i32_1 = arith.constant 0 : i32
    return %c0_i32, %c0_i32_0 : i32, i32
  }
  func.func @transform_5(%arg0: i32) -> (i32, i32) {
    %c0_i32 = arith.constant 0 : i32
    %c0_i32_0 = arith.constant 0 : i32
    %c0_i32_1 = arith.constant 0 : i32
    return %c0_i32, %c0_i32_0 : i32, i32
  }
  func.func @transform_6(%arg0: i32) -> (i32, i32) {
    %c0_i32 = arith.constant 0 : i32
    %c0_i32_0 = arith.constant 0 : i32
    %c0_i32_1 = arith.constant 0 : i32
    return %c0_i32, %c0_i32_0 : i32, i32
  }
  func.func @transform_7(%arg0: i32) -> (i32, i32) {
    %c0_i32 = arith.constant 0 : i32
    %c0_i32_0 = arith.constant 0 : i32
    return %arg0, %c0_i32 : i32, i32
  }
}

</mosaic_0001>

<bundles_post_ra>
// kernel: tpu_custom_call.1
= control target key start
LH: loop header
LB: loop body
LE: loop exit
PB: predicated region body
PF: predicated region fallthrough
CT: control target
= control target key end

     0   :  { %12 = vsyncpa [#allocation3], 0  ;;  %s604_s0 = inlined_call_operand.hbm [shape: f32[16,128], index: 0, kind: input, shape index: {}]   ;;  %s605_s1 = inlined_call_operand.hbm [shape: f32[128,128], index: 1, kind: input, shape index: {}]   ;;  %s606_s2 = inlined_call_operand.vmem [shape: f32[1,128], index: 2, kind: input, shape index: {}]   ;;  %s607_s3 = inlined_call_operand.hbm [shape: f32[128,128], index: 3, kind: input, shape index: {}]   ;;  %s608_s4 = inlined_call_operand.vmem [shape: f32[1,128], index: 4, kind: input, shape index: {}]   ;;  %s609_s5 = inlined_call_operand.vmem [shape: f32[1,128], index: 5, kind: input, shape index: {}]   ;;  %s610_s6 = inlined_call_operand.vmem [shape: f32[1,128], index: 6, kind: input, shape index: {}]   ;;  %s611_s7 = inlined_call_operand.hbm [shape: f32[16,128], index: 7, kind: output, shape index: {}]  }
   0x1   :  { %13 = vsyncpa [#allocation6], 0 }
   0x2   :  { %14 = vsyncpa [#allocation4], 0  ;;  %s32_s26 = sshll.u32 %s605_s1, 4  ;;  %s484_s27 = smov [#allocation5]   ;;  %s33_s26 = int_to_ptr.hbm [resolvable:$true] %s32_s26 }
   0x3   :  { %s34_s28 = sshll.u32 %s484_s27, 4  ;;  %s19_s8 = sshll.u32 %s604_s0, 4  ;;  %s35_s28 = int_to_ptr.vmem [resolvable:$true] %s34_s28  ;;  %s20_s8 = int_to_ptr.hbm [resolvable:$true] %s19_s8 }
   0x4   :  { %s485_s9 = smov 128   ;;  %s486_s10 = smov 8  }
   0x5   :  { %40 = dma.hbm_to_vmem [thread:$0]  %s33_s26, 2048, %s35_s28, [#allocation6], %s485_s9, %s485_s9, %s486_s10  }
   0x6   :  { %s487_s11 = smov [#allocation2]   ;;  %s47_s1 = sshll.u32 %s607_s3, 4  ;;  %s48_s1 = int_to_ptr.hbm [resolvable:$true] %s47_s1 }
   0x7   :  { %s21_s12 = sshll.u32 %s487_s11, 4  ;;  %s488_s0 = smov [#allocation7]   ;;  %s22_s12 = int_to_ptr.vmem [resolvable:$true] %s21_s12 }
   0x8   :  { %27 = dma.hbm_to_vmem [thread:$0]  %s20_s8, 256, %s22_s12, [#allocation3], %s485_s9, %s485_s9, %s486_s10  }
   0x9   :  { %s49_s15 = sshll.u32 %s488_s0, 4  ;;  %s50_s15 = int_to_ptr.vmem [resolvable:$true] %s49_s15 }
   0xa   :  { %55 = dma.hbm_to_vmem [thread:$0]  %s48_s1, 2048, %s50_s15, [#allocation6], %s485_s9, %s485_s9, %s486_s10  }
   0xb   :  { %478 = dma.done.wait [#allocation3], 256  }
   0xc   :  { %479 = vsyncadd [#allocation3], 4294967040 }
   0xd   :  { %480 = dma.done.wait [#allocation6], 4096  }
   0xe   :  { %481 = vsyncadd [#allocation6], 4294963200  ;;  %v91_v0 = vld [vmem:[#allocation5 + $0x78] sm:$0xff]  ;;  %v90_v1 = vld [vmem:[#allocation5 + $0x70] sm:$0xff]  ;;  %s316_s24 = sshll.u32 %s611_s7, 4  ;;  %s317_s24 = int_to_ptr.hbm [resolvable:$true] %s316_s24 }
   0xf   :  { %96 = vmatpush.msra.mxu0 %v91_v0  ;;  %332 = vmatpush.msra.mxu2 %v91_v0  ;;  %v89_v2 = vld [vmem:[#allocation5 + $0x68] sm:$0xff]  ;;  %v88_v3 = vld [vmem:[#allocation5 + $0x60] sm:$0xff]  ;;  %v87_v4 = vld [vmem:[#allocation5 + $0x58] sm:$0xff] }
  0x10   :  { %v86_v5 = vld [vmem:[#allocation5 + $0x50] sm:$0xff]  ;;  %v85_v6 = vld [vmem:[#allocation5 + $0x48] sm:$0xff]  ;;  %v84_v7 = vld [vmem:[#allocation5 + $0x40] sm:$0xff] }
  0x11   :  { %97 = vmatpush.msra.mxu0 %v90_v1  ;;  %333 = vmatpush.msra.mxu2 %v90_v1  ;;  %v83_v8 = vld [vmem:[#allocation5 + $0x38] sm:$0xff]  ;;  %v82_v9 = vld [vmem:[#allocation5 + $0x30] sm:$0xff]  ;;  %v81_v10 = vld [vmem:[#allocation5 + $0x28] sm:$0xff] }
  0x12   :  { %v80_v11 = vld [vmem:[#allocation5 + $0x20] sm:$0xff]  ;;  %v79_v12 = vld [vmem:[#allocation5 + $0x18] sm:$0xff]  ;;  %v78_v13 = vld [vmem:[#allocation5 + $0x10] sm:$0xff] }
  0x13   :  { %98 = vmatpush.msra.mxu0 %v89_v2  ;;  %334 = vmatpush.msra.mxu2 %v89_v2  ;;  %v77_v14 = vld [vmem:[#allocation5 + $0x8] sm:$0xff]  ;;  %v76_v15 = vld [vmem:[#allocation5] sm:$0xff]  ;;  %v548_v16 = vld [vmem:[#allocation2] sm:$0xff] }
  0x14   :  { %v550_v17 = vld [vmem:[#allocation2 + $0x8] sm:$0xff]  ;;  %v221_v19 = vld [vmem:[#allocation7 + $0x70] sm:$0xff]  ;;  %v220_v20 = vld [vmem:[#allocation7 + $0x68] sm:$0xff] }
  0x15   :  { %99 = vmatpush.msra.mxu0 %v88_v3  ;;  %335 = vmatpush.msra.mxu2 %v88_v3  ;;  %v222_v18 = vld [vmem:[#allocation7 + $0x78] sm:$0xff]  ;;  %v219_v21 = vld [vmem:[#allocation7 + $0x60] sm:$0xff]  ;;  %v370_v22 = vld [vmem:[%s606_s2] ss:$0 sm:$0xff] }
  0x16   :  { %227 = vmatpush.msra.mxu1 %v222_v18  ;;  %348 = vmatpush.msra.mxu3 %v222_v18  ;;  %v218_v23 = vld [vmem:[#allocation7 + $0x58] sm:$0xff]  ;;  %v217_v25 = vld [vmem:[#allocation7 + $0x50] sm:$0xff]  ;;  %v216_v27 = vld [vmem:[#allocation7 + $0x48] sm:$0xff] }
  0x17   :  { %100 = vmatpush.msra.mxu0 %v87_v4  ;;  %336 = vmatpush.msra.mxu2 %v87_v4  ;;  %v215_v29 = vld [vmem:[#allocation7 + $0x40] sm:$0xff]  ;;  %v214_v30 = vld [vmem:[#allocation7 + $0x38] sm:$0xff]  ;;  %v213_v33 = vld [vmem:[#allocation7 + $0x30] sm:$0xff] }
  0x18   :  { %228 = vmatpush.msra.mxu1 %v221_v19  ;;  %349 = vmatpush.msra.mxu3 %v221_v19  ;;  %v212_v36 = vld [vmem:[#allocation7 + $0x28] sm:$0xff]  ;;  %v211_v39 = vld [vmem:[#allocation7 + $0x20] sm:$0xff]  ;;  %v210_v43 = vld [vmem:[#allocation7 + $0x18] sm:$0xff] }
  0x19   :  { %101 = vmatpush.msra.mxu0 %v86_v5  ;;  %337 = vmatpush.msra.mxu2 %v86_v5  ;;  %v209_v47 = vld [vmem:[#allocation7 + $0x10] sm:$0xff]  ;;  %v208_v52 = vld [vmem:[#allocation7 + $0x8] sm:$0xff]  ;;  %v207_v56 = vld [vmem:[#allocation7] sm:$0xff] }
  0x1a   :  { %229 = vmatpush.msra.mxu1 %v220_v20  ;;  %350 = vmatpush.msra.mxu3 %v220_v20 }
  0x1b   :  { %102 = vmatpush.msra.mxu0 %v85_v6  ;;  %338 = vmatpush.msra.mxu2 %v85_v6 }
  0x1c   :  { %230 = vmatpush.msra.mxu1 %v219_v21  ;;  %351 = vmatpush.msra.mxu3 %v219_v21 }
  0x1d   :  { %103 = vmatpush.msra.mxu0 %v84_v7  ;;  %339 = vmatpush.msra.mxu2 %v84_v7 }
  0x1e   :  { %231 = vmatpush.msra.mxu1 %v218_v23  ;;  %352 = vmatpush.msra.mxu3 %v218_v23 }
  0x1f   :  { %104 = vmatpush.msra.mxu0 %v83_v8  ;;  %340 = vmatpush.msra.mxu2 %v83_v8 }
  0x20   :  { %232 = vmatpush.msra.mxu1 %v217_v25  ;;  %353 = vmatpush.msra.mxu3 %v217_v25 }
  0x21   :  { %105 = vmatpush.msra.mxu0 %v82_v9  ;;  %341 = vmatpush.msra.mxu2 %v82_v9 }
  0x22   :  { %233 = vmatpush.msra.mxu1 %v216_v27  ;;  %354 = vmatpush.msra.mxu3 %v216_v27 }
  0x23   :  { %106 = vmatpush.msra.mxu0 %v81_v10  ;;  %342 = vmatpush.msra.mxu2 %v81_v10 }
  0x24   :  { %234 = vmatpush.msra.mxu1 %v215_v29  ;;  %355 = vmatpush.msra.mxu3 %v215_v29 }
  0x25   :  { %107 = vmatpush.msra.mxu0 %v80_v11  ;;  %343 = vmatpush.msra.mxu2 %v80_v11 }
  0x26   :  { %235 = vmatpush.msra.mxu1 %v214_v30  ;;  %356 = vmatpush.msra.mxu3 %v214_v30 }
  0x27   :  { %108 = vmatpush.msra.mxu0 %v79_v12  ;;  %344 = vmatpush.msra.mxu2 %v79_v12 }
  0x28   :  { %236 = vmatpush.msra.mxu1 %v213_v33  ;;  %357 = vmatpush.msra.mxu3 %v213_v33 }
  0x29   :  { %109 = vmatpush.msra.mxu0 %v78_v13  ;;  %345 = vmatpush.msra.mxu2 %v78_v13 }
  0x2a   :  { %237 = vmatpush.msra.mxu1 %v212_v36  ;;  %358 = vmatpush.msra.mxu3 %v212_v36 }
  0x2b   :  { %110 = vmatpush.msra.mxu0 %v77_v14  ;;  %346 = vmatpush.msra.mxu2 %v77_v14 }
  0x2c   :  { %238 = vmatpush.msra.mxu1 %v211_v39  ;;  %359 = vmatpush.msra.mxu3 %v211_v39 }
  0x2d   :  { %111 = vmatpush.msra.mxu0 %v76_v15  ;;  %347 = vmatpush.msra.mxu2 %v76_v15 }
  0x2e   :  { %112 = vmatmul.f32.vlgmr.msra.gmra.mxu0 %v548_v16  ;;  %115 = vmatmul.f32.vlgmr.msra.gmra.mxu2 %v550_v17 }
  0x2f   :  { %239 = vmatpush.msra.mxu1 %v210_v43  ;;  %360 = vmatpush.msra.mxu3 %v210_v43 }
  0x31   :  { %240 = vmatpush.msra.mxu1 %v209_v47  ;;  %361 = vmatpush.msra.mxu3 %v209_v47 }
  0x33   :  { %241 = vmatpush.msra.mxu1 %v208_v52  ;;  %362 = vmatpush.msra.mxu3 %v208_v52 }
  0x35   :  { %242 = vmatpush.msra.mxu1 %v207_v56  ;;  %363 = vmatpush.msra.mxu3 %v207_v56 }
  0xab   :  { %v113_v24 = vpop.f32.mrf.mxu0 }
  0xac   :  { %v557_v26 = vadd.f32 %v370_v22, %v113_v24 }
  0xae   :  { %v560_v28 = vmul.f32 0.70710677, %v557_v26 }
  0xb0   :  { %v123_v31 = vmul.f32 %v560_v28, %v560_v28 }
  0xb1   :  { %v116_v32 = vpop.f32.mrf.mxu2 }
  0xb2   :  { %v564_v34 = vmin.f32 %v123_v31, 16.0  ;;  %v566_v35 = vadd.f32 %v370_v22, %v116_v32 }
  0xb4   :  { %v125_v37 = vmul.f32 2.1237322e-06, %v564_v34  ;;  %v570_v38 = vmul.f32 0.70710677, %v566_v35  ;;  %v136_v40 = vmul.f32 3.8918573e-05, %v564_v34 }
  0xb6   :  { %v126_v41 = vadd.f32 0.00028619796, %v125_v37  ;;  %v163_v42 = vmul.f32 %v570_v38, %v570_v38  ;;  %v137_v44 = vadd.f32 0.001143296, %v136_v40 }
  0xb8   :  { %v127_v45 = vmul.f32 %v126_v41, %v564_v34  ;;  %v164_v46 = vmin.f32 %v163_v42, 16.0  ;;  %v138_v48 = vmul.f32 %v137_v44, %v564_v34 }
  0xba   :  { %v165_v49 = vmul.f32 2.1237322e-06, %v164_v46  ;;  %v176_v50 = vmul.f32 3.8918573e-05, %v164_v46  ;;  %v128_v51 = vadd.f32 0.0036580483, %v127_v45 }
  0xbb   :  { %v139_v53 = vadd.f32 0.014752088, %v138_v48 }
  0xbc   :  { %v166_v54 = vadd.f32 0.00028619796, %v165_v49  ;;  %v177_v55 = vadd.f32 0.001143296, %v176_v50  ;;  %v129_v60 = vmul.f32 %v128_v51, %v564_v34  ;;  %v119_v49 = vmul.f32 0.5, %v557_v26 }
  0xbd   :  { %v140_v57 = vmul.f32 %v139_v53, %v564_v34 }
  0xbe   :  { %v167_v58 = vmul.f32 %v166_v54, %v164_v46  ;;  %v178_v59 = vmul.f32 %v177_v55, %v164_v46  ;;  %v130_v2 = vadd.f32 0.05243302, %v129_v60  ;;  %v120_v55 = vmul.f32 0.5, %v566_v35 }
  0xbf   :  { %v141_v61 = vadd.f32 0.112945676, %v140_v57 }
  0xc0   :  { %v168_v62 = vadd.f32 0.0036580483, %v167_v58  ;;  %v179_v63 = vadd.f32 0.014752088, %v178_v59  ;;  %v131_v8 = vmul.f32 %v130_v2, %v564_v34  ;;  %v371_v58 = vld [vmem:[%s608_s4] ss:$0 sm:$0xff] }
  0xc1   :  { %v142_v0 = vmul.f32 %v141_v61, %v564_v34 }
  0xc2   :  { %v180_v1 = vmul.f32 %v179_v63, %v164_v46  ;;  %v169_v4 = vmul.f32 %v168_v62, %v164_v46  ;;  %v132_v13 = vadd.f32 0.18741608, %v131_v8 }
  0xc3   :  { %v143_v3 = vadd.f32 0.4994258, %v142_v0 }
  0xc4   :  { %v181_v5 = vadd.f32 0.112945676, %v180_v1  ;;  %v170_v10 = vadd.f32 0.05243302, %v169_v4  ;;  %v133_v19 = vmul.f32 %v132_v13, %v564_v34 }
  0xc5   :  { %v144_v6 = vmul.f32 %v143_v3, %v564_v34 }
  0xc6   :  { %v182_v7 = vmul.f32 %v181_v5, %v164_v46  ;;  %v171_v14 = vmul.f32 %v170_v10, %v164_v46  ;;  %v134_v23 = vadd.f32 1.1283791, %v133_v19 }
  0xc7   :  { %v145_v9 = vadd.f32 1.0, %v144_v6 }
  0xc8   :  { %v183_v11 = vadd.f32 0.4994258, %v182_v7  ;;  %v172_v20 = vadd.f32 0.18741608, %v171_v14  ;;  %v135_v33 = vmul.f32 %v134_v23, %v560_v28 }
  0xc9   :  { %374 = vrcp.f32 %v145_v9  ;;  %v157_v24 = vand.u32 2147483648, %v145_v9  ;;  %v155_v30 = vand.u32 2147483647, %v145_v9  ;;  %vm151_vm1 = vweird.f32 %v145_v9 }
  0xca   :  { %v184_v12 = vmul.f32 %v183_v11, %v164_v46  ;;  %v173_v27 = vmul.f32 %v172_v20, %v164_v46 }
  0xcb   :  { %v158_v36 = vor.u32 1.1754944e-38, %v157_v24  ;;  %vm156_vm3 = vcmp.eq.f32.partialorder %v155_v30, 8.507059e+37 }
  0xcc   :  { %v185_v15 = vadd.f32 1.0, %v184_v12  ;;  %v174_v39 = vadd.f32 1.1283791, %v173_v27  ;;  %v373_v27 = vld [vmem:[%s610_s6] ss:$0 sm:$0xff] }
  0xce   :  { %376 = vrcp.f32 %v185_v15  ;;  %v197_v40 = vand.u32 2147483648, %v185_v15  ;;  %v195_v43 = vand.u32 2147483647, %v185_v15  ;;  %vm191_vm5 = vweird.f32 %v185_v15 }
  0xcf   :  { %v375_v18 = vpop.eup %374  ;;  %v175_v48 = vmul.f32 %v174_v39, %v570_v38 }
  0xd0   :  { %v147_v21 = vmul.f32 %v375_v18, %v145_v9  ;;  %vm152_vm0 = vweird.f32 %v375_v18  ;;  %v198_v47 = vor.u32 1.1754944e-38, %v197_v40  ;;  %vm196_vm7 = vcmp.eq.f32.partialorder %v195_v43, 8.507059e+37 }
  0xd1   :  { %vm153_vm2 = vmor %vm151_vm1, %vm152_vm0 }
  0xd2   :  { %v148_v22 = vsub.f32 1.0, %v147_v21  ;;  %v372_v21 = vld [vmem:[%s609_s5] ss:$0 sm:$0xff]  ;;  %s489_s5 = smov [#allocation8]  }
  0xd3   :  { %s314_s21 = sshll.u32 %s489_s5, 4  ;;  %s315_s21 = int_to_ptr.vmem [resolvable:$true] %s314_s21 }
  0xd4   :  { %v377_v25 = vpop.eup %376  ;;  %v149_v29 = vmul.f32 %v375_v18, %v148_v22 }
  0xd5   :  { %v187_v31 = vmul.f32 %v377_v25, %v185_v15  ;;  %vm192_vm4 = vweird.f32 %v377_v25 }
  0xd6   :  { %v150_v32 = vadd.f32 %v375_v18, %v149_v29  ;;  %vm193_vm6 = vmor %vm191_vm5, %vm192_vm4 }
  0xd7   :  { %v188_v37 = vsub.f32 1.0, %v187_v31 }
  0xd8   :  { %v154_v34 = vsel %vm153_vm2, %v375_v18, %v150_v32 }
  0xd9   :  { %v159_v41 = vsel %vm156_vm3, %v158_v36, %v154_v34  ;;  %v189_v42 = vmul.f32 %v377_v25, %v188_v37 }
  0xda   :  { %v160_v44 = vmul.f32 %v159_v41, %v135_v33 }
  0xdb   :  { %v190_v45 = vadd.f32 %v377_v25, %v189_v42 }
  0xdc   :  { %v330_v46 = vclamps-f32 %v160_v44, 1.0 }
  0xdd   :  { %v194_v28 = vsel %vm193_vm6, %v377_v25, %v190_v45 }
  0xde   :  { %v203_v50 = vadd.f32 1.0, %v330_v46  ;;  %v199_v51 = vsel %vm196_vm7, %v198_v47, %v194_v28 }
  0xdf   :  { %v200_v52 = vmul.f32 %v199_v51, %v175_v48 }
  0xe0   :  { %v205_v53 = vmul.f32 %v203_v50, %v119_v49 }
  0xe1   :  { %v331_v54 = vclamps-f32 %v200_v52, 1.0 }
  0xe2   :  { %243 = vmatmul.f32.vlgmr.msra.gmra.mxu1 %v205_v53 }
  0xe3   :  { %v204_v56 = vadd.f32 1.0, %v331_v54 }
  0xe5   :  { %v206_v57 = vmul.f32 %v204_v56, %v120_v55 }
  0xe7   :  { %246 = vmatmul.f32.vlgmr.msra.gmra.mxu3 %v206_v57 }
 0x15f   :  { %v244_v38 = vpop.f32.mrf.mxu1 }
 0x160   :  { %v245_v59 = vadd.f32 %v371_v58, %v244_v38 }
 0x162   :  { %v250_v60 = vadd.f32 %v245_v59, %v548_v16 }
 0x164   :  { %252 = vadd.xlane.f32.xlu0 %v250_v60  ;;  %v256_v26 = vmul.f32 %v250_v60, %v250_v60 }
 0x166   :  { %258 = vadd.xlane.f32.xlu1 %v256_v26 }
 0x16a   :  { %v247_v61 = vpop.f32.mrf.mxu3 }
 0x16b   :  { %v248_v62 = vadd.f32 %v371_v58, %v247_v61 }
 0x16d   :  { %v251_v63 = vadd.f32 %v248_v62, %v550_v17 }
 0x16f   :  { %254 = vadd.xlane.f32.xlu0 %v251_v63  ;;  %v257_v35 = vmul.f32 %v251_v63, %v251_v63 }
 0x171   :  { %260 = vadd.xlane.f32.xlu1 %v257_v35 }
 0x1d7   :  { %v253_v0 = vpop.xlane.xlu0 %252 }
 0x1d8   :  { %v262_v1 = vmul.f32 0.03125, %v253_v0 }
 0x1d9   :  { %v259_v2 = vpop.xlane.xlu1 %258 }
 0x1da   :  { %v266_v3 = vmul.f32 %v262_v1, %v262_v1  ;;  %v264_v4 = vmul.f32 0.03125, %v259_v2  ;;  %v270_v20 = vsub.f32 %v250_v60, %v262_v1 }
 0x1dc   :  { %v268_v5 = vsub.f32 %v264_v4, %v266_v3 }
 0x1de   :  { %v272_v6 = vadd.f32 1e-05, %v268_v5 }
 0x1e0   :  { %378 = vrsqrt.f32 %v272_v6  ;;  %vm280_vm9 = vweird.f32 %v272_v6 }
 0x1e2   :  { %v255_v7 = vpop.xlane.xlu0 %254 }
 0x1e3   :  { %v263_v16 = vmul.f32 0.03125, %v255_v7 }
 0x1e4   :  { %v261_v8 = vpop.xlane.xlu1 %260 }
 0x1e5   :  { %v267_v9 = vmul.f32 %v263_v16, %v263_v16  ;;  %v265_v10 = vmul.f32 0.03125, %v261_v8  ;;  %v271_v37 = vsub.f32 %v251_v63, %v263_v16 }
 0x1e6   :  { %v379_v11 = vpop.eup %378 }
 0x1e7   :  { %v275_v12 = vmul.f32 %v379_v11, %v272_v6  ;;  %v269_v13 = vsub.f32 %v265_v10, %v267_v9  ;;  %vm281_vm8 = vweird.f32 %v379_v11 }
 0x1e8   :  { %vm282_vm10 = vmor %vm280_vm9, %vm281_vm8 }
 0x1e9   :  { %v276_v17 = vmul.f32 %v379_v11, %v275_v12  ;;  %v273_v14 = vadd.f32 1e-05, %v269_v13 }
 0x1eb   :  { %v277_v15 = vmul.f32 0.5, %v276_v17  ;;  %380 = vrsqrt.f32 %v273_v14  ;;  %vm290_vm12 = vweird.f32 %v273_v14 }
 0x1ed   :  { %v278_v18 = vsub.f32 1.5, %v277_v15 }
 0x1ef   :  { %v279_v19 = vmul.f32 %v379_v11, %v278_v18 }
 0x1f1   :  { %v381_v22 = vpop.eup %380  ;;  %v283_v23 = vsel %vm282_vm10, %v379_v11, %v279_v19 }
 0x1f2   :  { %v285_v24 = vmul.f32 %v381_v22, %v273_v14  ;;  %v294_v25 = vmul.f32 %v283_v23, %v270_v20  ;;  %vm291_vm11 = vweird.f32 %v381_v22 }
 0x1f3   :  { %vm292_vm13 = vmor %vm290_vm12, %vm291_vm11 }
 0x1f4   :  { %v286_v29 = vmul.f32 %v381_v22, %v285_v24  ;;  %v300_v30 = vmul.f32 %v372_v21, %v294_v25 }
 0x1f6   :  { %v287_v31 = vmul.f32 0.5, %v286_v29  ;;  %v306_v32 = vadd.f32 %v373_v27, %v300_v30 }
 0x1f8   :  { %v288_v33 = vsub.f32 1.5, %v287_v31  ;;  %308 = vst [vmem:[#allocation8] sm:$0xff] %v306_v32 }
 0x1fa   :  { %v289_v36 = vmul.f32 %v381_v22, %v288_v33 }
 0x1fc   :  { %v293_v39 = vsel %vm292_vm13, %v381_v22, %v289_v36 }
 0x1fd   :  { %v295_v34 = vmul.f32 %v293_v39, %v271_v37 }
 0x1ff   :  { %v301_v40 = vmul.f32 %v372_v21, %v295_v34 }
 0x201   :  { %v307_v41 = vadd.f32 %v373_v27, %v301_v40 }
 0x203   :  { %309 = vst [vmem:[#allocation8 + $0x8] sm:$0xff] %v307_v41 }
 0x204   :  { %322 = dma.vmem_to_hbm [thread:$0]  %s315_s21, 256, %s317_s24, [#allocation4], %s485_s9, %s485_s9, %s486_s10  }
 0x205   :  { %482 = dma.done.wait [#allocation4], 256  }
 0x206   :  { %483 = vsyncadd [#allocation4], 4294967040 }
 0x207   :  { %327 = vsyncpa [#allocation3], 1 }
 0x208   :  { %328 = vsyncpa [#allocation6], 1 }
 0x209   :  { %329 = vsyncpa [#allocation4], 1 }

</bundles_post_ra>
